<compile_context>
chip_gen: v6e
topology: v6e:2x2x1
jax: 0.10.0
libtpu: 0.0.40
codegen_flags: <defaults>
</compile_context>

<pallas_src>
import functools
import math

import jax
import jax.numpy as jnp
import numpy as np
from jax import lax
from jax.experimental import pallas as pl
from jax.experimental.pallas import tpu as pltpu

_HALF_LOG_2PI = 0.5 * math.log(2.0 * math.pi)


def _tree_reduce(op, xs):
    """Balanced elementwise reduction tree over a list of arrays (better ILP)."""
    xs = list(xs)
    while len(xs) > 1:
        nxt = [op(xs[i], xs[i + 1]) for i in range(0, len(xs) - 1, 2)]
        if len(xs) % 2:
            nxt.append(xs[-1])
        xs = nxt
    return xs[0]


def gmm_logprob_kernel(yt_ref, a_ref, b_ref, c_ref, o_ref, *, chunk_rows):
    # yt_ref: (dim, block_r, W) VMEM tile of points (native dtype)
    # a_ref : (K, dim) SMEM   a = (1/sigma) * sqrt(0.5)
    # b_ref : (K, dim) SMEM   b = mu * a
    # c_ref : (K,)     SMEM   log w_k - sum_d log sigma_kd - dim/2*log(2pi)
    # o_ref : (block_r, W) VMEM f32 output log-probs
    dim = yt_ref.shape[0]
    K = a_ref.shape[0]
    block_r = o_ref.shape[0]
    num_chunks = block_r // chunk_rows

    # Hoist the tiny SMEM scalar reads out of the per-point loop.
    a = [[a_ref[k, d] for d in range(dim)] for k in range(K)]
    b = [[b_ref[k, d] for d in range(dim)] for k in range(K)]
    c = [c_ref[k] for k in range(K)]

    def chunk_body(j, carry):
        r0 = pl.multiple_of(j * chunk_rows, chunk_rows)
        # (chunk_rows, W) fully packed slabs, one per feature dimension.
        y = [yt_ref[d, pl.ds(r0, chunk_rows), :].astype(jnp.float32)
             for d in range(dim)]

        # Per-component log-probability (incl. log mixture weight): pure VPU.
        comps = []
        for k in range(K):
            acc = None
            for d in range(dim):
                z = y[d] * a[k][d] - b[k][d]
                zz = z * z
                acc = zz if acc is None else acc + zz
            comps.append(c[k] - acc)

        # logsumexp over the K components as an elementwise tree (VPU + EUP);
        # no cross-sublane reduction and no broadcast needed.
        m = _tree_reduce(jnp.maximum, list(comps))
        s = _tree_reduce(lambda p, q: p + q, [jnp.exp(ck - m) for ck in comps])
        o_ref[pl.ds(r0, chunk_rows), :] = (m + jnp.log(s)).astype(o_ref.dtype)
        return carry

    lax.fori_loop(0, num_chunks, chunk_body, 0)


def gmm_log_prob(Y, means, scales, log_weights, *,
                 row_width=256, max_block_rows=512, chunk_rows=8):
    """Y: (N, dim); means/scales: (K, dim); log_weights: (K,).  Returns (N,) f32."""
    N, dim = Y.shape
    K = means.shape[0]
    W = int(row_width)          # lanes per row (multiple of 128)
    cr = int(chunk_rows)        # rows per inner chunk (multiple of 8)

    # --- tiling: rows of W points, chunks of cr rows, block_r rows per step ---
    R = pl.cdiv(N, W)                               # rows needed
    R_chunks = pl.cdiv(R, cr)                       # row-chunks needed
    max_chunks = max(1, int(max_block_rows) // cr)
    chunks_per_step = min(max_chunks, R_chunks)
    # Guarantee >= 2 grid steps when there is enough work so v7x's second
    # TensorCore is used ("parallel" grid axis is sharded across cores).
    if pl.cdiv(R_chunks, chunks_per_step) == 1 and R_chunks >= 2:
        chunks_per_step = pl.cdiv(R_chunks, 2)
    block_r = chunks_per_step * cr
    grid_r = pl.cdiv(R_chunks, chunks_per_step)
    R_pad = grid_r * block_r
    n_pad = R_pad * W

    # --- data layout: (dim, R_pad, W), points row-major, native dtype ---
    yt = jnp.swapaxes(Y, 0, 1)                      # (dim, N)
    if n_pad != N:
        yt = jnp.pad(yt, ((0, 0), (0, n_pad - N)))
    yt = yt.reshape(dim, R_pad, W)

    # --- parameter-only math hoisted & folded (tiny arrays, done once) ---
    means_f = means.astype(jnp.float32)
    scales_f = scales.astype(jnp.float32)
    a = (1.0 / scales_f) * math.sqrt(0.5)           # (K, dim)
    b = means_f * a                                 # (K, dim)
    const = (log_weights.astype(jnp.float32)
             - jnp.sum(jnp.log(scales_f), axis=-1)
             - dim * _HALF_LOG_2PI)                 # (K,)

    kernel = functools.partial(gmm_logprob_kernel, chunk_rows=cr)
    out = pl.pallas_call(
        kernel,
        out_shape=jax.ShapeDtypeStruct((R_pad, W), jnp.float32),
        grid=(grid_r,),
        in_specs=[
            pl.BlockSpec((dim, block_r, W), lambda i: (0, i, 0)),      # points
            pl.BlockSpec(memory_space=pltpu.MemorySpace.SMEM),         # a
            pl.BlockSpec(memory_space=pltpu.MemorySpace.SMEM),         # b
            pl.BlockSpec(memory_space=pltpu.MemorySpace.SMEM),         # const
        ],
        out_specs=pl.BlockSpec((block_r, W), lambda i: (i, 0)),
        compiler_params=pltpu.CompilerParams(
            dimension_semantics=("parallel",)),
    )(yt, a, b, const)
    return out.reshape(-1)[:N]


if __name__ == "__main__":
    # --- deterministic synthetic parameters (mirrors GMM.__init__) ---
    K, dim = 8, 2
    key = jax.random.PRNGKey(0)
    k_y, k_ind, k_w, k_ls = jax.random.split(key, 4)

    N0 = 5000
    Y_full = 3.0 * jax.random.normal(k_y, (N0, dim), dtype=jnp.float32)   # data points
    ind = jax.random.randint(k_ind, (K,), 0, N0)                          # np.random.choice(len(Y), K)
    raw_weights = jax.random.normal(k_w, (K,), dtype=jnp.float32)         # nn.Parameter(randn(K))
    means = Y_full[ind]                                                   # nn.Parameter(Y[ind])
    log_scales = jax.random.normal(k_ls, (K, dim), dtype=jnp.float32)     # nn.Parameter(randn(K, dim))

    # _update(): weights = softmax(raw_weights); scales = exp(log_scales)
    log_weights = raw_weights - jax.scipy.special.logsumexp(raw_weights)
    scales = jnp.exp(log_scales)

    def reference(Y):
        z = (Y[:, None, :] - means[None, :, :]) / scales[None, :, :]
        comp_lp = (-0.5 * jnp.sum(z * z, axis=-1)
                   - jnp.sum(jnp.log(scales), axis=-1)[None, :]
                   - dim * _HALF_LOG_2PI)
        return jax.scipy.special.logsumexp(comp_lp + log_weights[None, :], axis=-1)

    # Aligned, ragged-small, and multi-step / multi-chunk cases.
    for n in (256, 200, 5000):
        Y = Y_full[:n]
        lp = gmm_log_prob(Y, means, scales, log_weights)
        lp = jax.block_until_ready(lp)
        ref = reference(Y)
        np.testing.assert_allclose(np.asarray(lp), np.asarray(ref), rtol=1e-5, atol=1e-5)

    print("KERNEL_OK")
</pallas_src>

<mosaic_0001>
module attributes {stable_mosaic.version = 11 : i64} {
  func.func @gmm_logprob_kernel(%arg0: i32, %arg1: memref<2x8x256xf32, #tpu.memory_space<vmem>>, %arg2: memref<8x2xf32, #tpu.memory_space<smem>>, %arg3: memref<8x2xf32, #tpu.memory_space<smem>>, %arg4: memref<8xf32, #tpu.memory_space<smem>>, %arg5: memref<8x256xf32, #tpu.memory_space<vmem>>) attributes {dimension_semantics = [#tpu.dimension_semantics<parallel>], iteration_bounds = array<i64: 1>, scalar_prefetch = 0 : i64, scratch_operands = 0 : i64, tpu.core_type = #tpu.core_type<tc>, window_params = [{transform_indices = @transform_0, window_bounds = array<i64: 2, 8, 256>}, {transform_indices = @transform_1, window_bounds = array<i64: 8, 2>}, {transform_indices = @transform_2, window_bounds = array<i64: 8, 2>}, {transform_indices = @transform_3, window_bounds = array<i64: 8>}, {transform_indices = @transform_4, window_bounds = array<i64: 8, 256>}]} {
    %c0 = arith.constant 0 : index
    %c0_0 = arith.constant 0 : index
    %0 = memref.load %arg2[%c0, %c0_0] : memref<8x2xf32, #tpu.memory_space<smem>>
    %c0_1 = arith.constant 0 : index
    %c1 = arith.constant 1 : index
    %1 = memref.load %arg2[%c0_1, %c1] : memref<8x2xf32, #tpu.memory_space<smem>>
    %c1_2 = arith.constant 1 : index
    %c0_3 = arith.constant 0 : index
    %2 = memref.load %arg2[%c1_2, %c0_3] : memref<8x2xf32, #tpu.memory_space<smem>>
    %c1_4 = arith.constant 1 : index
    %c1_5 = arith.constant 1 : index
    %3 = memref.load %arg2[%c1_4, %c1_5] : memref<8x2xf32, #tpu.memory_space<smem>>
    %c2 = arith.constant 2 : index
    %c0_6 = arith.constant 0 : index
    %4 = memref.load %arg2[%c2, %c0_6] : memref<8x2xf32, #tpu.memory_space<smem>>
    %c2_7 = arith.constant 2 : index
    %c1_8 = arith.constant 1 : index
    %5 = memref.load %arg2[%c2_7, %c1_8] : memref<8x2xf32, #tpu.memory_space<smem>>
    %c3 = arith.constant 3 : index
    %c0_9 = arith.constant 0 : index
    %6 = memref.load %arg2[%c3, %c0_9] : memref<8x2xf32, #tpu.memory_space<smem>>
    %c3_10 = arith.constant 3 : index
    %c1_11 = arith.constant 1 : index
    %7 = memref.load %arg2[%c3_10, %c1_11] : memref<8x2xf32, #tpu.memory_space<smem>>
    %c4 = arith.constant 4 : index
    %c0_12 = arith.constant 0 : index
    %8 = memref.load %arg2[%c4, %c0_12] : memref<8x2xf32, #tpu.memory_space<smem>>
    %c4_13 = arith.constant 4 : index
    %c1_14 = arith.constant 1 : index
    %9 = memref.load %arg2[%c4_13, %c1_14] : memref<8x2xf32, #tpu.memory_space<smem>>
    %c5 = arith.constant 5 : index
    %c0_15 = arith.constant 0 : index
    %10 = memref.load %arg2[%c5, %c0_15] : memref<8x2xf32, #tpu.memory_space<smem>>
    %c5_16 = arith.constant 5 : index
    %c1_17 = arith.constant 1 : index
    %11 = memref.load %arg2[%c5_16, %c1_17] : memref<8x2xf32, #tpu.memory_space<smem>>
    %c6 = arith.constant 6 : index
    %c0_18 = arith.constant 0 : index
    %12 = memref.load %arg2[%c6, %c0_18] : memref<8x2xf32, #tpu.memory_space<smem>>
    %c6_19 = arith.constant 6 : index
    %c1_20 = arith.constant 1 : index
    %13 = memref.load %arg2[%c6_19, %c1_20] : memref<8x2xf32, #tpu.memory_space<smem>>
    %c7 = arith.constant 7 : index
    %c0_21 = arith.constant 0 : index
    %14 = memref.load %arg2[%c7, %c0_21] : memref<8x2xf32, #tpu.memory_space<smem>>
    %c7_22 = arith.constant 7 : index
    %c1_23 = arith.constant 1 : index
    %15 = memref.load %arg2[%c7_22, %c1_23] : memref<8x2xf32, #tpu.memory_space<smem>>
    %c0_24 = arith.constant 0 : index
    %c0_25 = arith.constant 0 : index
    %16 = memref.load %arg3[%c0_24, %c0_25] : memref<8x2xf32, #tpu.memory_space<smem>>
    %c0_26 = arith.constant 0 : index
    %c1_27 = arith.constant 1 : index
    %17 = memref.load %arg3[%c0_26, %c1_27] : memref<8x2xf32, #tpu.memory_space<smem>>
    %c1_28 = arith.constant 1 : index
    %c0_29 = arith.constant 0 : index
    %18 = memref.load %arg3[%c1_28, %c0_29] : memref<8x2xf32, #tpu.memory_space<smem>>
    %c1_30 = arith.constant 1 : index
    %c1_31 = arith.constant 1 : index
    %19 = memref.load %arg3[%c1_30, %c1_31] : memref<8x2xf32, #tpu.memory_space<smem>>
    %c2_32 = arith.constant 2 : index
    %c0_33 = arith.constant 0 : index
    %20 = memref.load %arg3[%c2_32, %c0_33] : memref<8x2xf32, #tpu.memory_space<smem>>
    %c2_34 = arith.constant 2 : index
    %c1_35 = arith.constant 1 : index
    %21 = memref.load %arg3[%c2_34, %c1_35] : memref<8x2xf32, #tpu.memory_space<smem>>
    %c3_36 = arith.constant 3 : index
    %c0_37 = arith.constant 0 : index
    %22 = memref.load %arg3[%c3_36, %c0_37] : memref<8x2xf32, #tpu.memory_space<smem>>
    %c3_38 = arith.constant 3 : index
    %c1_39 = arith.constant 1 : index
    %23 = memref.load %arg3[%c3_38, %c1_39] : memref<8x2xf32, #tpu.memory_space<smem>>
    %c4_40 = arith.constant 4 : index
    %c0_41 = arith.constant 0 : index
    %24 = memref.load %arg3[%c4_40, %c0_41] : memref<8x2xf32, #tpu.memory_space<smem>>
    %c4_42 = arith.constant 4 : index
    %c1_43 = arith.constant 1 : index
    %25 = memref.load %arg3[%c4_42, %c1_43] : memref<8x2xf32, #tpu.memory_space<smem>>
    %c5_44 = arith.constant 5 : index
    %c0_45 = arith.constant 0 : index
    %26 = memref.load %arg3[%c5_44, %c0_45] : memref<8x2xf32, #tpu.memory_space<smem>>
    %c5_46 = arith.constant 5 : index
    %c1_47 = arith.constant 1 : index
    %27 = memref.load %arg3[%c5_46, %c1_47] : memref<8x2xf32, #tpu.memory_space<smem>>
    %c6_48 = arith.constant 6 : index
    %c0_49 = arith.constant 0 : index
    %28 = memref.load %arg3[%c6_48, %c0_49] : memref<8x2xf32, #tpu.memory_space<smem>>
    %c6_50 = arith.constant 6 : index
    %c1_51 = arith.constant 1 : index
    %29 = memref.load %arg3[%c6_50, %c1_51] : memref<8x2xf32, #tpu.memory_space<smem>>
    %c7_52 = arith.constant 7 : index
    %c0_53 = arith.constant 0 : index
    %30 = memref.load %arg3[%c7_52, %c0_53] : memref<8x2xf32, #tpu.memory_space<smem>>
    %c7_54 = arith.constant 7 : index
    %c1_55 = arith.constant 1 : index
    %31 = memref.load %arg3[%c7_54, %c1_55] : memref<8x2xf32, #tpu.memory_space<smem>>
    %c0_56 = arith.constant 0 : index
    %32 = memref.load %arg4[%c0_56] : memref<8xf32, #tpu.memory_space<smem>>
    %c1_57 = arith.constant 1 : index
    %33 = memref.load %arg4[%c1_57] : memref<8xf32, #tpu.memory_space<smem>>
    %c2_58 = arith.constant 2 : index
    %34 = memref.load %arg4[%c2_58] : memref<8xf32, #tpu.memory_space<smem>>
    %c3_59 = arith.constant 3 : index
    %35 = memref.load %arg4[%c3_59] : memref<8xf32, #tpu.memory_space<smem>>
    %c4_60 = arith.constant 4 : index
    %36 = memref.load %arg4[%c4_60] : memref<8xf32, #tpu.memory_space<smem>>
    %c5_61 = arith.constant 5 : index
    %37 = memref.load %arg4[%c5_61] : memref<8xf32, #tpu.memory_space<smem>>
    %c6_62 = arith.constant 6 : index
    %38 = memref.load %arg4[%c6_62] : memref<8xf32, #tpu.memory_space<smem>>
    %c7_63 = arith.constant 7 : index
    %39 = memref.load %arg4[%c7_63] : memref<8xf32, #tpu.memory_space<smem>>
    %c0_i32 = arith.constant 0 : i32
    %c8_i32 = arith.constant 8 : i32
    %40 = arith.muli %c0_i32, %c8_i32 : i32
    %41 = tpu.assume_multiple %40, 8 : i32
    %c0_64 = arith.constant 0 : index
    %42 = arith.index_cast %41 : i32 to index
    %c0_65 = arith.constant 0 : index
    %43 = vector.load %arg1[%c0_64, %42, %c0_65] : memref<2x8x256xf32, #tpu.memory_space<vmem>>, vector<1x8x256xf32>
    %44 = vector.shape_cast %43 : vector<1x8x256xf32> to vector<8x256xf32>
    %c1_66 = arith.constant 1 : index
    %45 = arith.index_cast %41 : i32 to index
    %c0_67 = arith.constant 0 : index
    %46 = vector.load %arg1[%c1_66, %45, %c0_67] : memref<2x8x256xf32, #tpu.memory_space<vmem>>, vector<1x8x256xf32>
    %47 = vector.shape_cast %46 : vector<1x8x256xf32> to vector<8x256xf32>
    %48 = vector.broadcast %0 : f32 to vector<8x256xf32>
    %49 = arith.mulf %44, %48 : vector<8x256xf32>
    %50 = vector.broadcast %16 : f32 to vector<8x256xf32>
    %51 = arith.subf %49, %50 : vector<8x256xf32>
    %52 = arith.mulf %51, %51 : vector<8x256xf32>
    %53 = vector.broadcast %1 : f32 to vector<8x256xf32>
    %54 = arith.mulf %47, %53 : vector<8x256xf32>
    %55 = vector.broadcast %17 : f32 to vector<8x256xf32>
    %56 = arith.subf %54, %55 : vector<8x256xf32>
    %57 = arith.mulf %56, %56 : vector<8x256xf32>
    %58 = arith.addf %52, %57 : vector<8x256xf32>
    %59 = vector.broadcast %32 : f32 to vector<8x256xf32>
    %60 = arith.subf %59, %58 : vector<8x256xf32>
    %61 = vector.broadcast %2 : f32 to vector<8x256xf32>
    %62 = arith.mulf %44, %61 : vector<8x256xf32>
    %63 = vector.broadcast %18 : f32 to vector<8x256xf32>
    %64 = arith.subf %62, %63 : vector<8x256xf32>
    %65 = arith.mulf %64, %64 : vector<8x256xf32>
    %66 = vector.broadcast %3 : f32 to vector<8x256xf32>
    %67 = arith.mulf %47, %66 : vector<8x256xf32>
    %68 = vector.broadcast %19 : f32 to vector<8x256xf32>
    %69 = arith.subf %67, %68 : vector<8x256xf32>
    %70 = arith.mulf %69, %69 : vector<8x256xf32>
    %71 = arith.addf %65, %70 : vector<8x256xf32>
    %72 = vector.broadcast %33 : f32 to vector<8x256xf32>
    %73 = arith.subf %72, %71 : vector<8x256xf32>
    %74 = vector.broadcast %4 : f32 to vector<8x256xf32>
    %75 = arith.mulf %44, %74 : vector<8x256xf32>
    %76 = vector.broadcast %20 : f32 to vector<8x256xf32>
    %77 = arith.subf %75, %76 : vector<8x256xf32>
    %78 = arith.mulf %77, %77 : vector<8x256xf32>
    %79 = vector.broadcast %5 : f32 to vector<8x256xf32>
    %80 = arith.mulf %47, %79 : vector<8x256xf32>
    %81 = vector.broadcast %21 : f32 to vector<8x256xf32>
    %82 = arith.subf %80, %81 : vector<8x256xf32>
    %83 = arith.mulf %82, %82 : vector<8x256xf32>
    %84 = arith.addf %78, %83 : vector<8x256xf32>
    %85 = vector.broadcast %34 : f32 to vector<8x256xf32>
    %86 = arith.subf %85, %84 : vector<8x256xf32>
    %87 = vector.broadcast %6 : f32 to vector<8x256xf32>
    %88 = arith.mulf %44, %87 : vector<8x256xf32>
    %89 = vector.broadcast %22 : f32 to vector<8x256xf32>
    %90 = arith.subf %88, %89 : vector<8x256xf32>
    %91 = arith.mulf %90, %90 : vector<8x256xf32>
    %92 = vector.broadcast %7 : f32 to vector<8x256xf32>
    %93 = arith.mulf %47, %92 : vector<8x256xf32>
    %94 = vector.broadcast %23 : f32 to vector<8x256xf32>
    %95 = arith.subf %93, %94 : vector<8x256xf32>
    %96 = arith.mulf %95, %95 : vector<8x256xf32>
    %97 = arith.addf %91, %96 : vector<8x256xf32>
    %98 = vector.broadcast %35 : f32 to vector<8x256xf32>
    %99 = arith.subf %98, %97 : vector<8x256xf32>
    %100 = vector.broadcast %8 : f32 to vector<8x256xf32>
    %101 = arith.mulf %44, %100 : vector<8x256xf32>
    %102 = vector.broadcast %24 : f32 to vector<8x256xf32>
    %103 = arith.subf %101, %102 : vector<8x256xf32>
    %104 = arith.mulf %103, %103 : vector<8x256xf32>
    %105 = vector.broadcast %9 : f32 to vector<8x256xf32>
    %106 = arith.mulf %47, %105 : vector<8x256xf32>
    %107 = vector.broadcast %25 : f32 to vector<8x256xf32>
    %108 = arith.subf %106, %107 : vector<8x256xf32>
    %109 = arith.mulf %108, %108 : vector<8x256xf32>
    %110 = arith.addf %104, %109 : vector<8x256xf32>
    %111 = vector.broadcast %36 : f32 to vector<8x256xf32>
    %112 = arith.subf %111, %110 : vector<8x256xf32>
    %113 = vector.broadcast %10 : f32 to vector<8x256xf32>
    %114 = arith.mulf %44, %113 : vector<8x256xf32>
    %115 = vector.broadcast %26 : f32 to vector<8x256xf32>
    %116 = arith.subf %114, %115 : vector<8x256xf32>
    %117 = arith.mulf %116, %116 : vector<8x256xf32>
    %118 = vector.broadcast %11 : f32 to vector<8x256xf32>
    %119 = arith.mulf %47, %118 : vector<8x256xf32>
    %120 = vector.broadcast %27 : f32 to vector<8x256xf32>
    %121 = arith.subf %119, %120 : vector<8x256xf32>
    %122 = arith.mulf %121, %121 : vector<8x256xf32>
    %123 = arith.addf %117, %122 : vector<8x256xf32>
    %124 = vector.broadcast %37 : f32 to vector<8x256xf32>
    %125 = arith.subf %124, %123 : vector<8x256xf32>
    %126 = vector.broadcast %12 : f32 to vector<8x256xf32>
    %127 = arith.mulf %44, %126 : vector<8x256xf32>
    %128 = vector.broadcast %28 : f32 to vector<8x256xf32>
    %129 = arith.subf %127, %128 : vector<8x256xf32>
    %130 = arith.mulf %129, %129 : vector<8x256xf32>
    %131 = vector.broadcast %13 : f32 to vector<8x256xf32>
    %132 = arith.mulf %47, %131 : vector<8x256xf32>
    %133 = vector.broadcast %29 : f32 to vector<8x256xf32>
    %134 = arith.subf %132, %133 : vector<8x256xf32>
    %135 = arith.mulf %134, %134 : vector<8x256xf32>
    %136 = arith.addf %130, %135 : vector<8x256xf32>
    %137 = vector.broadcast %38 : f32 to vector<8x256xf32>
    %138 = arith.subf %137, %136 : vector<8x256xf32>
    %139 = vector.broadcast %14 : f32 to vector<8x256xf32>
    %140 = arith.mulf %44, %139 : vector<8x256xf32>
    %141 = vector.broadcast %30 : f32 to vector<8x256xf32>
    %142 = arith.subf %140, %141 : vector<8x256xf32>
    %143 = arith.mulf %142, %142 : vector<8x256xf32>
    %144 = vector.broadcast %15 : f32 to vector<8x256xf32>
    %145 = arith.mulf %47, %144 : vector<8x256xf32>
    %146 = vector.broadcast %31 : f32 to vector<8x256xf32>
    %147 = arith.subf %145, %146 : vector<8x256xf32>
    %148 = arith.mulf %147, %147 : vector<8x256xf32>
    %149 = arith.addf %143, %148 : vector<8x256xf32>
    %150 = vector.broadcast %39 : f32 to vector<8x256xf32>
    %151 = arith.subf %150, %149 : vector<8x256xf32>
    %152 = arith.maximumf %60, %73 : vector<8x256xf32>
    %153 = arith.maximumf %86, %99 : vector<8x256xf32>
    %154 = arith.maximumf %112, %125 : vector<8x256xf32>
    %155 = arith.maximumf %138, %151 : vector<8x256xf32>
    %156 = arith.maximumf %152, %153 : vector<8x256xf32>
    %157 = arith.maximumf %154, %155 : vector<8x256xf32>
    %158 = arith.maximumf %156, %157 : vector<8x256xf32>
    %159 = arith.subf %60, %158 : vector<8x256xf32>
    %160 = math.exp %159 : vector<8x256xf32>
    %161 = arith.subf %73, %158 : vector<8x256xf32>
    %162 = math.exp %161 : vector<8x256xf32>
    %163 = arith.subf %86, %158 : vector<8x256xf32>
    %164 = math.exp %163 : vector<8x256xf32>
    %165 = arith.subf %99, %158 : vector<8x256xf32>
    %166 = math.exp %165 : vector<8x256xf32>
    %167 = arith.subf %112, %158 : vector<8x256xf32>
    %168 = math.exp %167 : vector<8x256xf32>
    %169 = arith.subf %125, %158 : vector<8x256xf32>
    %170 = math.exp %169 : vector<8x256xf32>
    %171 = arith.subf %138, %158 : vector<8x256xf32>
    %172 = math.exp %171 : vector<8x256xf32>
    %173 = arith.subf %151, %158 : vector<8x256xf32>
    %174 = math.exp %173 : vector<8x256xf32>
    %175 = arith.addf %160, %162 : vector<8x256xf32>
    %176 = arith.addf %164, %166 : vector<8x256xf32>
    %177 = arith.addf %168, %170 : vector<8x256xf32>
    %178 = arith.addf %172, %174 : vector<8x256xf32>
    %179 = arith.addf %175, %176 : vector<8x256xf32>
    %180 = arith.addf %177, %178 : vector<8x256xf32>
    %181 = arith.addf %179, %180 : vector<8x256xf32>
    %182 = math.log %181 : vector<8x256xf32>
    %183 = arith.addf %158, %182 : vector<8x256xf32>
    %184 = arith.index_cast %41 : i32 to index
    %c0_68 = arith.constant 0 : index
    %185 = vector.load %arg5[%184, %c0_68] : memref<8x256xf32, #tpu.memory_space<vmem>>, vector<8x256xf32>
    tpu.vector_store %arg5[%184, %c0_68], %183 {strides = array<i32>} : memref<8x256xf32, #tpu.memory_space<vmem>>, vector<8x256xf32>,
    %c1_i32 = arith.constant 1 : i32
    return
  }
  func.func @transform_0(%arg0: i32) -> (i32, i32, i32) {
    %c0_i32 = arith.constant 0 : i32
    %c0_i32_0 = arith.constant 0 : i32
    %c0_i32_1 = arith.constant 0 : i32
    return %c0_i32, %arg0, %c0_i32_0 : i32, i32, i32
  }
  func.func @transform_1(%arg0: i32) -> (i32, i32) {
    %c0_i32 = arith.constant 0 : i32
    %c0_i32_0 = arith.constant 0 : i32
    %c0_i32_1 = arith.constant 0 : i32
    return %c0_i32, %c0_i32_0 : i32, i32
  }
  func.func @transform_2(%arg0: i32) -> (i32, i32) {
    %c0_i32 = arith.constant 0 : i32
    %c0_i32_0 = arith.constant 0 : i32
    %c0_i32_1 = arith.constant 0 : i32
    return %c0_i32, %c0_i32_0 : i32, i32
  }
  func.func @transform_3(%arg0: i32) -> i32 {
    %c0_i32 = arith.constant 0 : i32
    %c0_i32_0 = arith.constant 0 : i32
    return %c0_i32 : i32
  }
  func.func @transform_4(%arg0: i32) -> (i32, i32) {
    %c0_i32 = arith.constant 0 : i32
    %c0_i32_0 = arith.constant 0 : i32
    return %arg0, %c0_i32 : i32, i32
  }
}

</mosaic_0001>

<bundles_post_ra>
// kernel: tpu_custom_call.1
= control target key start
LH: loop header
LB: loop body
LE: loop exit
PB: predicated region body
PF: predicated region fallthrough
CT: control target
= control target key end

     0   :  { %9 = vsyncpa [#allocation3], 0  ;;  %s880_s0 = inlined_call_operand.hbm [shape: f32[2,8,256], index: 0, kind: input, shape index: {}]   ;;  %s881_s1 = inlined_call_operand.vmem [shape: f32[8,2], index: 1, kind: input, shape index: {}]   ;;  %s882_s2 = inlined_call_operand.vmem [shape: f32[8,2], index: 2, kind: input, shape index: {}]   ;;  %s883_s3 = inlined_call_operand.vmem [shape: f32[8], index: 3, kind: input, shape index: {}]   ;;  %s884_s4 = inlined_call_operand.hbm [shape: f32[8,256], index: 4, kind: output, shape index: {}]  }
   0x1   :  { %10 = vsyncpa [#allocation5], 0 }
   0x2   :  { %11 = vsyncpa [#allocation8], 0  ;;  %s41_s17 = sshll.u32 %s882_s2, 4  ;;  %s42_s17 = int_to_ptr.vmem [resolvable:$true] %s41_s17 }
   0x3   :  { %12 = vsyncpa [#allocation4], 0  ;;  %s470_s18 = scalar_lea.vmem %s42_s17, 128  ;;  %p475_p1 = scmp.lt.s32.totalorder %s42_s17, %s42_s17 }
   0x4   :  { %p471_p0 = scmp.ne.s32.totalorder %s42_s17, %s470_s18  ;;  %p476_p2 = scmp.lt.s32.totalorder %s470_s18, %s470_s18 }
   0x6   :  { %p477_p3 = por %p476_p2, %p475_p1 }
   0x8   :  { %p478_p4 = pnand %p477_p3, %p471_p0 }
   0xa   :  { %481 = shalt.err (!%p478_p4)
}
   0xb   :  { %s554_s19 = smov [#allocation7]   ;;  %s555_s20 = smov [#allocation2]  }
   0xc   :  { %44 = dma.vmem_to_smem %s42_s17, 128, %s554_s19, [#allocation8]  }
   0xd   :  { %s18_s21 = sshll.u32 %s555_s20, 4  ;;  %s19_s21 = int_to_ptr.vmem [resolvable:$true] %s18_s21 }
   0xe   :  { %s490_s22 = scalar_lea.vmem %s19_s21, 512  ;;  %p495_p6 = scmp.lt.s32.totalorder %s19_s21, %s19_s21 }
   0xf   :  { %p491_p5 = scmp.ne.s32.totalorder %s19_s21, %s490_s22  ;;  %p496_p7 = scmp.lt.s32.totalorder %s490_s22, %s490_s22 }
  0x11   :  { %p497_p8 = por %p496_p7, %p495_p6 }
  0x13   :  { %p498_p9 = pnand %p497_p8, %p491_p5 }
  0x15   :  { %501 = shalt.err (!%p498_p9)
}
  0x16   :  { %s556_s2 = smov 256   ;;  %s557_s23 = smov 16  }
  0x17   :  { %24 = dma.hbm_to_vmem [thread:$0]  %s880_s0, 512, %s19_s21, [#allocation3], %s556_s2, %s556_s2, %s557_s23  }
  0x18   :  { %s31_s28 = sshll.u32 %s881_s1, 4  ;;  %s51_s5 = sshll.u32 %s883_s3, 4  ;;  %s32_s28 = int_to_ptr.vmem [resolvable:$true] %s31_s28  ;;  %s52_s5 = int_to_ptr.vmem [resolvable:$true] %s51_s5 }
  0x19   :  { %s502_s6 = scalar_lea.vmem %s32_s28, 128  ;;  %p507_p11 = scmp.lt.s32.totalorder %s32_s28, %s32_s28 }
  0x1a   :  { %p503_p10 = scmp.ne.s32.totalorder %s32_s28, %s502_s6  ;;  %p508_p12 = scmp.lt.s32.totalorder %s502_s6, %s502_s6 }
  0x1c   :  { %p509_p13 = por %p508_p12, %p507_p11 }
  0x1e   :  { %p510_p0 = pnand %p509_p13, %p503_p10 }
  0x20   :  { %513 = shalt.err (!%p510_p0)
}
  0x21   :  { %s558_s7 = smov [#allocation6]   ;;  %s514_s0 = scalar_lea.vmem %s52_s5, 16 }
  0x22   :  { %34 = dma.vmem_to_smem %s32_s28, 128, %s558_s7, [#allocation5]  }
  0x23   :  { %p515_p1 = scmp.ne.s32.totalorder %s52_s5, %s514_s0  ;;  %p519_p2 = scmp.lt.s32.totalorder %s52_s5, %s52_s5 }
  0x24   :  { %p520_p3 = scmp.lt.s32.totalorder %s514_s0, %s514_s0 }
  0x26   :  { %p521_p4 = por %p520_p3, %p519_p2 }
  0x28   :  { %p522_p5 = pnand %p521_p4, %p515_p1 }
  0x2a   :  { %525 = shalt.err (!%p522_p5)
}
  0x2b   :  { %s559_s1 = smov [#allocation9]  }
  0x2c   :  { %54 = dma.vmem_to_smem %s52_s5, 16, %s559_s1, [#allocation8]  }
  0x2d   :  { %546 = dma.done.wait [#allocation3], 512  }
  0x2e   :  { %547 = vsyncadd [#allocation3], 4294966784 }
  0x2f   :  { %548 = dma.done.wait [#allocation5], 128  }
  0x30   :  { %549 = vsyncadd [#allocation5], 4294967168 }
  0x31   :  { %550 = dma.done.wait [#allocation8], 144  }
  0x32   :  { %551 = vsyncadd [#allocation8], 4294967152 }
  0x33   :  { %67 = sfence }
  0x34   :  { %s68_s3 = sld [smem:[#allocation6]]  ;;  %v111_v0 = vld [vmem:[#allocation2] sm:$0xff]  ;;  %v614_v2 = vld [vmem:[#allocation2 + $0x8] sm:$0xff]  ;;  %v616_v3 = vld [vmem:[#allocation2 + $0x10] sm:$0xff] }
  0x35   :  { %s390_s8 = sld [smem:[#allocation6 + $0x1]]  ;;  %v618_v4 = vld [vmem:[#allocation2 + $0x18] sm:$0xff] }
  0x36   :  { %s391_s9 = sld [smem:[#allocation6 + $0x80]] }
  0x37   :  { %s598_s10 = sld [smem:[#allocation6 + $0x81]] }
  0x38   :  { %s600_s11 = sld [smem:[#allocation6 + $0x100]] }
  0x39   :  { %s602_s12 = sld [smem:[#allocation6 + $0x101]] }
  0x3a   :  { %s604_s13 = sld [smem:[#allocation6 + $0x180]]  ;;  %v118_v1 = vstv %s68_s3 }
  0x3b   :  { %s606_s14 = sld [smem:[#allocation6 + $0x181]]  ;;  %v126_v5 = vstv %s390_s8  ;;  %v119_v8 = vmul.f32 %v118_v1, %v111_v0  ;;  %v120_v10 = vmul.f32 %v118_v1, %v614_v2 }
  0x3c   :  { %s608_s15 = sld [smem:[#allocation6 + $0x200]]  ;;  %v139_v6 = vstv %s391_s9  ;;  %v127_v11 = vmul.f32 %v126_v5, %v616_v3  ;;  %v128_v12 = vmul.f32 %v126_v5, %v618_v4 }
  0x3d   :  { %s610_s16 = sld [smem:[#allocation6 + $0x201]]  ;;  %v147_v7 = vstv %s598_s10  ;;  %v140_v14 = vmul.f32 %v139_v6, %v111_v0  ;;  %v141_v15 = vmul.f32 %v139_v6, %v614_v2 }
  0x3e   :  { %s612_s17 = sld [smem:[#allocation6 + $0x280]]  ;;  %v160_v9 = vstv %s600_s11  ;;  %v636_v16 = vmul.f32 %v147_v7, %v616_v3  ;;  %v149_v18 = vmul.f32 %v147_v7, %v618_v4 }
  0x3f   :  { %s620_s18 = sld [smem:[#allocation6 + $0x281]]  ;;  %v168_v13 = vstv %s602_s12  ;;  %v642_v19 = vmul.f32 %v160_v9, %v111_v0  ;;  %v162_v22 = vmul.f32 %v160_v9, %v614_v2 }
  0x40   :  { %s623_s19 = sld [smem:[#allocation6 + $0x300]]  ;;  %v181_v17 = vstv %s604_s13  ;;  %v650_v23 = vmul.f32 %v168_v13, %v616_v3  ;;  %v653_v24 = vmul.f32 %v168_v13, %v618_v4 }
  0x41   :  { %s626_s20 = sld [smem:[#allocation6 + $0x301]]  ;;  %v189_v20 = vstv %s606_s14  ;;  %v658_v26 = vmul.f32 %v181_v17, %v111_v0  ;;  %v661_v27 = vmul.f32 %v181_v17, %v614_v2 }
  0x42   :  { %s632_s21 = sld [smem:[#allocation6 + $0x380]]  ;;  %v202_v21 = vstv %s608_s15  ;;  %v668_v30 = vmul.f32 %v189_v20, %v616_v3  ;;  %v671_v31 = vmul.f32 %v189_v20, %v618_v4 }
  0x43   :  { %s639_s22 = sld [smem:[#allocation6 + $0x381]]  ;;  %v210_v25 = vstv %s610_s16  ;;  %v673_v32 = vmul.f32 %v202_v21, %v111_v0  ;;  %v679_v34 = vmul.f32 %v202_v21, %v614_v2 }
  0x44   :  { %s646_s2 = sld [smem:[#allocation7]]  ;;  %v223_v28 = vstv %s612_s17  ;;  %v682_v35 = vmul.f32 %v210_v25, %v616_v3  ;;  %v685_v36 = vmul.f32 %v210_v25, %v618_v4  ;;  %s560_s17 = smov [#allocation10]  }
  0x45   :  { %s656_s23 = sld [smem:[#allocation7 + $0x1]]  ;;  %v231_v29 = vstv %s620_s18  ;;  %v690_v38 = vmul.f32 %v223_v28, %v111_v0  ;;  %v693_v39 = vmul.f32 %v223_v28, %v614_v2  ;;  %s378_s18 = sshll.u32 %s560_s17, 4  ;;  %s379_s18 = int_to_ptr.vmem [resolvable:$true] %s378_s18 }
  0x46   :  { %s665_s24 = sld [smem:[#allocation7 + $0x80]]  ;;  %v244_v33 = vstv %s623_s19  ;;  %v696_v40 = vmul.f32 %v231_v29, %v616_v3  ;;  %v702_v42 = vmul.f32 %v231_v29, %v618_v4  ;;  %s526_s19 = scalar_lea.vmem %s379_s18, 256 }
  0x47   :  { %s676_s25 = sld [smem:[#allocation7 + $0x81]]  ;;  %v252_v37 = vstv %s626_s20  ;;  %v704_v43 = vmul.f32 %v244_v33, %v111_v0  ;;  %v707_v44 = vmul.f32 %v244_v33, %v614_v2  ;;  %p527_p6 = scmp.ne.s32.totalorder %s379_s18, %s526_s19 }
  0x48   :  { %s688_s26 = sld [smem:[#allocation7 + $0x100]]  ;;  %v265_v41 = vstv %s632_s21  ;;  %v714_v47 = vmul.f32 %v252_v37, %v616_v3  ;;  %v717_v48 = vmul.f32 %v252_v37, %v618_v4  ;;  %p531_p7 = scmp.lt.s32.totalorder %s379_s18, %s379_s18 }
  0x49   :  { %s699_s27 = sld [smem:[#allocation7 + $0x101]]  ;;  %v273_v45 = vstv %s639_s22  ;;  %v719_v49 = vmul.f32 %v265_v41, %v111_v0  ;;  %v725_v53 = vmul.f32 %v265_v41, %v614_v2  ;;  %p532_p8 = scmp.lt.s32.totalorder %s526_s19, %s526_s19 }
  0x4a   :  { %s710_s28 = sld [smem:[#allocation7 + $0x180]]  ;;  %v121_v46 = vstv %s646_s2  ;;  %v731_v57 = vmul.f32 %v273_v45, %v616_v3  ;;  %v741_v3 = vmul.f32 %v273_v45, %v618_v4 }
  0x4b   :  { %s721_s29 = sld [smem:[#allocation7 + $0x181]]  ;;  %v122_v50 = vsub.f32 %v119_v8, %v121_v46  ;;  %v123_v51 = vsub.f32 %v120_v10, %v121_v46  ;;  %v129_v52 = vstv %s656_s23  ;;  %p533_p9 = por %p532_p8, %p531_p7 }
  0x4c   :  { %s727_s30 = sld [smem:[#allocation7 + $0x200]]  ;;  %v130_v54 = vsub.f32 %v127_v11, %v129_v52  ;;  %v131_v55 = vsub.f32 %v128_v12, %v129_v52  ;;  %v142_v56 = vstv %s665_s24 }
  0x4d   :  { %v124_v58 = vmul.f32 %v122_v50, %v122_v50  ;;  %v125_v59 = vmul.f32 %v123_v51, %v123_v51  ;;  %v143_v60 = vsub.f32 %v140_v14, %v142_v56  ;;  %v144_v61 = vsub.f32 %v141_v15, %v142_v56  ;;  %s733_s5 = sld [smem:[#allocation7 + $0x201]]  ;;  %p534_p10 = pnand %p533_p9, %p527_p6 }
  0x4e   :  { %v132_v62 = vmul.f32 %v130_v54, %v130_v54  ;;  %v133_v63 = vmul.f32 %v131_v55, %v131_v55  ;;  %v150_v0 = vstv %s676_s25  ;;  %v163_v1 = vstv %s688_s26  ;;  %s737_s6 = sld [smem:[#allocation7 + $0x280]] }
  0x4f   :  { %v145_v2 = vmul.f32 %v143_v60, %v143_v60  ;;  %v151_v5 = vsub.f32 %v636_v16, %v150_v0  ;;  %v152_v6 = vsub.f32 %v149_v18, %v150_v0  ;;  %s743_s7 = sld [smem:[#allocation7 + $0x281]]  ;;  %v146_v8 = vmul.f32 %v144_v61, %v144_v61 }
  0x50   :  { %v134_v7 = vadd.f32 %v132_v62, %v124_v58  ;;  %v164_v9 = vsub.f32 %v642_v19, %v163_v1  ;;  %v165_v10 = vsub.f32 %v162_v22, %v163_v1  ;;  %s746_s0 = sld [smem:[#allocation7 + $0x300]]  ;;  %v135_v11 = vadd.f32 %v133_v63, %v125_v59 }
  0x51   :  { %v153_v12 = vmul.f32 %v151_v5, %v151_v5  ;;  %v171_v13 = vstv %s699_s27  ;;  %v184_v14 = vstv %s710_s28  ;;  %s750_s1 = sld [smem:[#allocation7 + $0x301]]  ;;  %v154_v15 = vmul.f32 %v152_v6, %v152_v6 }
  0x52   :  { %v166_v4 = vmul.f32 %v164_v9, %v164_v9  ;;  %v172_v16 = vsub.f32 %v650_v23, %v171_v13  ;;  %v173_v17 = vsub.f32 %v653_v24, %v171_v13  ;;  %s754_s3 = sld [smem:[#allocation7 + $0x380]]  ;;  %v167_v19 = vmul.f32 %v165_v10, %v165_v10 }
  0x53   :  { %v155_v18 = vadd.f32 %v153_v12, %v145_v2  ;;  %v185_v20 = vsub.f32 %v658_v26, %v184_v14  ;;  %v186_v21 = vsub.f32 %v661_v27, %v184_v14  ;;  %s758_s8 = sld [smem:[#allocation9]]  ;;  %v192_v28 = vstv %s721_s29 }
  0x54   :  { %v174_v22 = vmul.f32 %v172_v16, %v172_v16  ;;  %v175_v25 = vmul.f32 %v173_v17, %v173_v17  ;;  %v205_v29 = vstv %s727_s30  ;;  %s762_s9 = sld [smem:[#allocation9 + $0x1]]  ;;  %v193_v33 = vsub.f32 %v668_v30, %v192_v28 }
  0x55   :  { %v187_v23 = vmul.f32 %v185_v20, %v185_v20  ;;  %v188_v24 = vmul.f32 %v186_v21, %v186_v21  ;;  %v194_v37 = vsub.f32 %v671_v31, %v192_v28  ;;  %s766_s10 = sld [smem:[#allocation9 + $0x2]]  ;;  %v156_v26 = vadd.f32 %v154_v15, %v146_v8 }
  0x56   :  { %v176_v27 = vadd.f32 %v174_v22, %v166_v4  ;;  %v206_v41 = vsub.f32 %v673_v32, %v205_v29  ;;  %v207_v45 = vsub.f32 %v679_v34, %v205_v29  ;;  %s770_s11 = sld [smem:[#allocation9 + $0x3]]  ;;  %v195_v46 = vmul.f32 %v193_v33, %v193_v33 }
  0x57   :  { %v196_v50 = vmul.f32 %v194_v37, %v194_v37  ;;  %v213_v51 = vstv %s733_s5  ;;  %v226_v52 = vstv %s737_s6  ;;  %s774_s12 = sld [smem:[#allocation9 + $0x4]]  ;;  %v177_v30 = vadd.f32 %v175_v25, %v167_v19 }
  0x58   :  { %v208_v31 = vmul.f32 %v206_v41, %v206_v41  ;;  %v214_v54 = vsub.f32 %v682_v35, %v213_v51  ;;  %v215_v55 = vsub.f32 %v685_v36, %v213_v51  ;;  %s778_s13 = sld [smem:[#allocation9 + $0x5]]  ;;  %v197_v32 = vadd.f32 %v195_v46, %v187_v23 }
  0x59   :  { %v198_v34 = vadd.f32 %v196_v50, %v188_v24  ;;  %v209_v56 = vmul.f32 %v207_v45, %v207_v45  ;;  %v227_v58 = vsub.f32 %v690_v38, %v226_v52  ;;  %s781_s14 = sld [smem:[#allocation7 + $0x381]]  ;;  %v136_v59 = vstv %s758_s8 }
  0x5a   :  { %v216_v60 = vmul.f32 %v214_v54, %v214_v54  ;;  %v217_v61 = vmul.f32 %v215_v55, %v215_v55  ;;  %v228_v62 = vsub.f32 %v693_v39, %v226_v52  ;;  %v785_v63 = vsub.f32 %v136_v59, %v134_v7  ;;  %s794_s15 = sld [smem:[#allocation9 + $0x6]] }
  0x5b   :  { %v787_v35 = vsub.f32 %v136_v59, %v135_v11  ;;  %v157_v36 = vstv %s762_s9  ;;  %v234_v0 = vstv %s743_s7  ;;  %v178_v2 = vstv %s766_s10  ;;  %s808_s16 = sld [smem:[#allocation9 + $0x7]] }
  0x5c   :  { %v791_v1 = vsub.f32 %v157_v36, %v155_v18  ;;  %v218_v5 = vadd.f32 %v216_v60, %v208_v31  ;;  %v229_v38 = vmul.f32 %v227_v58, %v227_v58  ;;  %v796_v6 = vsub.f32 %v157_v36, %v156_v26 }
  0x5d   :  { %v798_v39 = vsub.f32 %v178_v2, %v176_v27  ;;  %v199_v7 = vstv %s770_s11  ;;  %v219_v8 = vadd.f32 %v217_v61, %v209_v56  ;;  %v801_v9 = vsub.f32 %v178_v2, %v177_v30 }
  0x5e   :  { %v803_v10 = vsub.f32 %v199_v7, %v197_v32  ;;  %v805_v11 = vsub.f32 %v199_v7, %v198_v34  ;;  %v220_v12 = vstv %s774_s12  ;;  %v230_v14 = vmul.f32 %v228_v62, %v228_v62 }
  0x5f   :  { %v810_v13 = vsub.f32 %v220_v12, %v218_v5  ;;  %v235_v15 = vsub.f32 %v696_v40, %v234_v0  ;;  %v236_v4 = vsub.f32 %v702_v42, %v234_v0  ;;  %v814_v16 = vsub.f32 %v220_v12, %v219_v8 }
  0x60   :  { %v241_v17 = vstv %s778_s13  ;;  %v247_v18 = vstv %s746_s0  ;;  %v255_v19 = vstv %s750_s1  ;;  %v268_v23 = vstv %s754_s3 }
  0x61   :  { %v237_v20 = vmul.f32 %v235_v15, %v235_v15  ;;  %v238_v21 = vmul.f32 %v236_v4, %v236_v4  ;;  %v248_v22 = vsub.f32 %v704_v43, %v247_v18  ;;  %v249_v25 = vsub.f32 %v707_v44, %v247_v18 }
  0x62   :  { %v256_v28 = vsub.f32 %v714_v47, %v255_v19  ;;  %v257_v29 = vsub.f32 %v717_v48, %v255_v19  ;;  %v276_v40 = vstv %s781_s14  ;;  %v269_v41 = vsub.f32 %v719_v49, %v268_v23 }
  0x63   :  { %v239_v24 = vadd.f32 %v237_v20, %v229_v38  ;;  %v240_v42 = vadd.f32 %v238_v21, %v230_v14  ;;  %v250_v33 = vmul.f32 %v248_v22, %v248_v22  ;;  %v251_v37 = vmul.f32 %v249_v25, %v249_v25 }
  0x64   :  { %v258_v26 = vmul.f32 %v256_v28, %v256_v28  ;;  %v259_v27 = vmul.f32 %v257_v29, %v257_v29  ;;  %v270_v45 = vsub.f32 %v725_v53, %v268_v23  ;;  %v262_v44 = vstv %s794_s15 }
  0x65   :  { %v827_v43 = vsub.f32 %v241_v17, %v239_v24  ;;  %v277_v47 = vsub.f32 %v731_v57, %v276_v40  ;;  %v278_v48 = vsub.f32 %v741_v3, %v276_v40  ;;  %v271_v51 = vmul.f32 %v269_v41, %v269_v41 }
  0x66   :  { %v260_v46 = vadd.f32 %v258_v26, %v250_v33  ;;  %v261_v50 = vadd.f32 %v259_v27, %v251_v37  ;;  %v272_v52 = vmul.f32 %v270_v45, %v270_v45  ;;  %v243_v30 = vsub.f32 %v241_v17, %v240_v42 }
  0x67   :  { %v279_v31 = vmul.f32 %v277_v47, %v277_v47  ;;  %v280_v54 = vmul.f32 %v278_v48, %v278_v48  ;;  %v283_v55 = vstv %s808_s16  ;;  %v286_v49 = vmax.f32 %v785_v63, %v791_v1 }
  0x68   :  { %v263_v32 = vsub.f32 %v262_v44, %v260_v46  ;;  %v264_v34 = vsub.f32 %v262_v44, %v261_v50  ;;  %v287_v53 = vmax.f32 %v787_v35, %v796_v6  ;;  %v288_v3 = vmax.f32 %v798_v39, %v803_v10 }
  0x69   :  { %v281_v56 = vadd.f32 %v279_v31, %v271_v51  ;;  %v282_v57 = vadd.f32 %v280_v54, %v272_v52  ;;  %v289_v58 = vmax.f32 %v801_v9, %v805_v11  ;;  %v290_v61 = vmax.f32 %v810_v13, %v827_v43 }
  0x6a   :  { %v291_v62 = vmax.f32 %v814_v16, %v243_v30  ;;  %v294_v2 = vmax.f32 %v286_v49, %v288_v3 }
  0x6b   :  { %v284_v59 = vsub.f32 %v283_v55, %v281_v56  ;;  %v285_v60 = vsub.f32 %v283_v55, %v282_v57  ;;  %v295_v5 = vmax.f32 %v287_v53, %v289_v58 }
  0x6d   :  { %v292_v36 = vmax.f32 %v263_v32, %v284_v59  ;;  %v293_v0 = vmax.f32 %v264_v34, %v285_v60 }
  0x6f   :  { %v296_v38 = vmax.f32 %v290_v61, %v292_v36  ;;  %v297_v7 = vmax.f32 %v291_v62, %v293_v0 }
  0x71   :  { %v844_v8 = vmax.f32 %v294_v2, %v296_v38  ;;  %v846_v12 = vmax.f32 %v295_v5, %v297_v7 }
  0x73   :  { %v300_v14 = vsub.f32 %v785_v63, %v844_v8  ;;  %v301_v15 = vsub.f32 %v787_v35, %v846_v12  ;;  %v306_v4 = vsub.f32 %v791_v1, %v844_v8  ;;  %v307_v17 = vsub.f32 %v796_v6, %v846_v12 }
  0x74   :  { %v312_v18 = vsub.f32 %v798_v39, %v844_v8  ;;  %v313_v19 = vsub.f32 %v801_v9, %v846_v12  ;;  %v318_v63 = vsub.f32 %v803_v10, %v844_v8  ;;  %v319_v35 = vsub.f32 %v805_v11, %v846_v12 }
  0x75   :  { %v302_v20 = vmul.f32 1.442695, %v300_v14  ;;  %v304_v21 = vmul.f32 1.442695, %v301_v15  ;;  %v308_v22 = vmul.f32 1.442695, %v306_v4  ;;  %v324_v6 = vsub.f32 %v810_v13, %v844_v8 }
  0x76   :  { %v310_v25 = vmul.f32 1.442695, %v307_v17  ;;  %v314_v1 = vmul.f32 1.442695, %v312_v18  ;;  %v316_v39 = vmul.f32 1.442695, %v313_v19  ;;  %v325_v9 = vsub.f32 %v814_v16, %v846_v12 }
  0x77   :  { %434 = vpow2.f32 %v302_v20  ;;  %v320_v28 = vmul.f32 1.442695, %v318_v63  ;;  %v330_v29 = vsub.f32 %v827_v43, %v844_v8  ;;  %v322_v10 = vmul.f32 1.442695, %v319_v35 }
  0x78   :  { %436 = vpow2.f32 %v304_v21  ;;  %v331_v23 = vsub.f32 %v243_v30, %v846_v12  ;;  %v326_v11 = vmul.f32 1.442695, %v324_v6  ;;  %v336_v40 = vsub.f32 %v263_v32, %v844_v8 }
  0x79   :  { %438 = vpow2.f32 %v308_v22  ;;  %v328_v13 = vmul.f32 1.442695, %v325_v9  ;;  %v337_v24 = vsub.f32 %v264_v34, %v846_v12  ;;  %v332_v42 = vmul.f32 1.442695, %v330_v29 }
  0x7a   :  { %440 = vpow2.f32 %v310_v25  ;;  %v342_v16 = vsub.f32 %v284_v59, %v844_v8  ;;  %v334_v33 = vmul.f32 1.442695, %v331_v23  ;;  %v343_v37 = vsub.f32 %v285_v60, %v846_v12 }
  0x7b   :  { %442 = vpow2.f32 %v314_v1  ;;  %v338_v26 = vmul.f32 1.442695, %v336_v40  ;;  %v340_v27 = vmul.f32 1.442695, %v337_v24 }
  0x7c   :  { %444 = vpow2.f32 %v316_v39  ;;  %v344_v41 = vmul.f32 1.442695, %v342_v16  ;;  %v346_v45 = vmul.f32 1.442695, %v343_v37 }
  0x7d   :  { %446 = vpow2.f32 %v320_v28 }
  0x7e   :  { %448 = vpow2.f32 %v322_v10 }
  0x7f   :  { %450 = vpow2.f32 %v326_v11 }
  0x80   :  { %452 = vpow2.f32 %v328_v13 }
  0x81   :  { %454 = vpow2.f32 %v332_v42 }
  0x82   :  { %456 = vpow2.f32 %v334_v33 }
  0x83   :  { %458 = vpow2.f32 %v338_v26 }
  0x84   :  { %v435_v43 = vpop.eup %434  ;;  %460 = vpow2.f32 %v340_v27 }
  0x85   :  { %v437_v44 = vpop.eup %436  ;;  %462 = vpow2.f32 %v344_v41 }
  0x86   :  { %v439_v47 = vpop.eup %438  ;;  %464 = vpow2.f32 %v346_v45 }
  0x87   :  { %v441_v48 = vpop.eup %440  ;;  %v348_v32 = vadd.f32 %v439_v47, %v435_v43 }
  0x88   :  { %v443_v46 = vpop.eup %442  ;;  %v349_v53 = vadd.f32 %v441_v48, %v437_v44 }
  0x89   :  { %v445_v50 = vpop.eup %444 }
  0x8a   :  { %v447_v51 = vpop.eup %446 }
  0x8b   :  { %v449_v52 = vpop.eup %448  ;;  %v350_v34 = vadd.f32 %v447_v51, %v443_v46 }
  0x8c   :  { %v451_v30 = vpop.eup %450  ;;  %v351_v56 = vadd.f32 %v449_v52, %v445_v50 }
  0x8d   :  { %v453_v31 = vpop.eup %452  ;;  %v356_v62 = vadd.f32 %v350_v34, %v348_v32 }
  0x8e   :  { %v455_v54 = vpop.eup %454  ;;  %v357_v0 = vadd.f32 %v351_v56, %v349_v53 }
  0x8f   :  { %v457_v55 = vpop.eup %456  ;;  %v352_v3 = vadd.f32 %v455_v54, %v451_v30 }
  0x90   :  { %v459_v49 = vpop.eup %458  ;;  %v353_v59 = vadd.f32 %v457_v55, %v453_v31 }
  0x91   :  { %v461_v57 = vpop.eup %460 }
  0x92   :  { %v463_v58 = vpop.eup %462 }
  0x93   :  { %v465_v60 = vpop.eup %464  ;;  %v354_v61 = vadd.f32 %v463_v58, %v459_v49 }
  0x94   :  { %v355_v36 = vadd.f32 %v465_v60, %v461_v57 }
  0x95   :  { %v358_v2 = vadd.f32 %v354_v61, %v352_v3 }
  0x96   :  { %v359_v5 = vadd.f32 %v355_v36, %v353_v59 }
  0x97   :  { %v360_v38 = vadd.f32 %v358_v2, %v356_v62 }
  0x98   :  { %v361_v7 = vadd.f32 %v359_v5, %v357_v0 }
  0x99   :  { %466 = vlog2.f32 %v360_v38 }
  0x9a   :  { %468 = vlog2.f32 %v361_v7 }
  0xa6   :  { %v467_v14 = vpop.eup %466 }
  0xa7   :  { %v469_v15 = vpop.eup %468  ;;  %v363_v4 = vmul.f32 0.6931472, %v467_v14 }
  0xa8   :  { %v365_v17 = vmul.f32 0.6931472, %v469_v15 }
  0xa9   :  { %v366_v18 = vadd.f32 %v363_v4, %v844_v8 }
  0xaa   :  { %v367_v19 = vadd.f32 %v365_v17, %v846_v12 }
  0xab   :  { %370 = vst [vmem:[#allocation10] sm:$0xff] %v366_v18 }
  0xac   :  { %371 = vst [vmem:[#allocation10 + $0x8] sm:$0xff] %v367_v19 }
  0xad   :  { %537 = shalt.err (!%p534_p10)
}
  0xae   :  { %381 = dma.vmem_to_hbm [thread:$0]  %s379_s18, 256, %s884_s4, [#allocation4]  }
  0xaf   :  { %552 = dma.done.wait [#allocation4], 256  }
  0xb0   :  { %553 = vsyncadd [#allocation4], 4294967040 }
  0xb1   :  { %385 = vsyncpa [#allocation3], 1 }
  0xb2   :  { %386 = vsyncpa [#allocation4], 1 }
  0xb3   :  { %387 = vsyncpa [#allocation5], 1 }
  0xb4   :  { %388 = vsyncpa [#allocation8], 1 }

</bundles_post_ra>
